<compile_context>
chip_gen: v7x
topology: tpu7x:2x2x1
jax: 0.10.0
libtpu: 0.0.40
codegen_flags: <defaults>
</compile_context>

<pallas_src>
import math

import jax
import jax.numpy as jnp
from jax import lax
from jax.experimental import pallas as pl
from jax.experimental.pallas import tpu as pltpu

# ---- model hyper-parameters (small, consistent with the module) ------------
B = 2          # batch
T = 8          # sequence length (block_size)
C = 32         # n_embd
H = 4          # n_head
D = C // H     # head dim
EPS = 1e-5
SCALE = 1.0 / math.sqrt(D)
NEG = -1e30    # additive mask value; exp() underflows to exactly 0.0


def _layer_norm(h, w, b):
    # PyTorch F.layer_norm: biased variance, eps inside sqrt.
    mu = jnp.mean(h, axis=-1, keepdims=True)
    var = jnp.mean((h - mu) ** 2, axis=-1, keepdims=True)
    return (h - mu) * lax.rsqrt(var + EPS) * w + b


def block_kernel(x_ref, mask_ref,
                 ln1w_ref, ln1b_ref,
                 wqkv_ref, bqkv_ref, wo_ref, bo_ref,
                 ln2w_ref, ln2b_ref,
                 wfc_ref, bfc_ref, wpr_ref, bpr_ref,
                 out_ref):
    # Whole batch in one invocation; fold batch into rows: (B*T, C).
    x = x_ref[...].astype(jnp.float32).reshape(B * T, C)
    mask_bias = mask_ref[...]                       # (B*T, B*T): 0.0 or NEG

    # ---------------- attention branch ----------------
    h = _layer_norm(x, ln1w_ref[...], ln1b_ref[...])          # (BT, C)

    # Fused QKV projection: one (BT, C) @ (C, 3C) matmul.
    qkv = jnp.dot(h, wqkv_ref[...],
                  preferred_element_type=jnp.float32) + bqkv_ref[...]
    q = qkv[:, 0 * C:1 * C]
    k = qkv[:, 1 * C:2 * C]
    v = qkv[:, 2 * C:3 * C]

    # Per-head attention over the flattened rows.  The additive mask is
    # block-diagonal (same batch) AND causal, so batches never attend to each
    # other and every row keeps its (unmasked) diagonal -> no all-masked rows.
    heads = []
    for hd in range(H):                     # H small & static -> fully unrolled
        lo = hd * D
        qh = q[:, lo:lo + D]                # (BT, D)
        kh = k[:, lo:lo + D]
        vh = v[:, lo:lo + D]
        # scores = qh @ kh.T (contract last dims, no explicit transpose)
        s = lax.dot_general(qh, kh, (((1,), (1,)), ((), ())),
                            preferred_element_type=jnp.float32)
        s = s * SCALE + mask_bias
        s = s - jnp.max(s, axis=-1, keepdims=True)
        p = jnp.exp(s)
        p = p * pl.reciprocal(jnp.sum(p, axis=-1, keepdims=True), approx=True)
        heads.append(jnp.dot(p, vh, preferred_element_type=jnp.float32))
    y = jnp.concatenate(heads, axis=-1)                       # (BT, C)

    y = jnp.dot(y, wo_ref[...],
                preferred_element_type=jnp.float32) + bo_ref[...]
    x1 = x + y                                                # first residual

    # ---------------- MLP branch ----------------
    h2 = _layer_norm(x1, ln2w_ref[...], ln2b_ref[...])
    f = jnp.dot(h2, wfc_ref[...],
                preferred_element_type=jnp.float32) + bfc_ref[...]
    # exact GELU (nn.GELU default, erf formulation)
    g = 0.5 * f * (1.0 + lax.erf(f * (1.0 / math.sqrt(2.0))))
    m = jnp.dot(g, wpr_ref[...],
                preferred_element_type=jnp.float32) + bpr_ref[...]

    out_ref[...] = (x1 + m).reshape(B, T, C).astype(out_ref.dtype)


def transformer_block(x, params):
    """x: (B, T, C) float32.  params: dict of pre-transposed weights."""
    Bx, Tx, Cx = x.shape

    # Fuse QKV weights/biases outside the kernel (plain JAX, one-time).
    wqkv = jnp.concatenate([params["wq"], params["wk"], params["wv"]], axis=1)
    bqkv = jnp.concatenate([params["bq"], params["bk"], params["bv"]], axis=1)

    # Block-diagonal causal additive mask over the flattened (B*T) rows,
    # built on the host side so the kernel does zero iota / select work.
    idx = jnp.arange(Bx * Tx)
    same_b = (idx[:, None] // Tx) == (idx[None, :] // Tx)
    causal = (idx[None, :] % Tx) <= (idx[:, None] % Tx)
    mask_bias = jnp.where(same_b & causal, 0.0, NEG).astype(jnp.float32)

    ordered = [
        mask_bias,
        params["ln1w"], params["ln1b"],
        wqkv, bqkv, params["wo"], params["bo"],
        params["ln2w"], params["ln2b"],
        params["wfc"], params["bfc"], params["wpr"], params["bpr"],
    ]

    def full_spec(arr):
        nd = arr.ndim
        return pl.BlockSpec(arr.shape, lambda i, _nd=nd: (0,) * _nd)

    # Single grid step: whole batch per invocation; every operand is a full
    # (constant-index) block.  NOTE(scaling): at real nanoGPT dims (C=768) the
    # MLP weights should be K-tiled / single-buffered instead of whole-resident
    # to stay within v7x's 64 MiB VMEM.
    in_specs = [pl.BlockSpec((Bx, Tx, Cx), lambda i: (0, 0, 0))]
    in_specs += [full_spec(a) for a in ordered]

    kernel = pl.pallas_call(
        block_kernel,
        out_shape=jax.ShapeDtypeStruct((Bx, Tx, Cx), x.dtype),
        grid_spec=pltpu.PrefetchScalarGridSpec(
            num_scalar_prefetch=0,
            grid=(1,),
            in_specs=in_specs,
            out_specs=pl.BlockSpec((Bx, Tx, Cx), lambda i: (0, 0, 0)),
        ),
        compiler_params=pltpu.CompilerParams(
            dimension_semantics=("arbitrary",)),
    )
    return kernel(x, *ordered)


# ---------------- pure-JAX reference (for correctness check) ----------------
def ref_block(x, p):
    def ln(h, w, b):
        mu = h.mean(-1, keepdims=True)
        var = ((h - mu) ** 2).mean(-1, keepdims=True)
        return (h - mu) / jnp.sqrt(var + EPS) * w + b

    h = ln(x, p["ln1w"][0], p["ln1b"][0])
    q = h @ p["wq"] + p["bq"][0]
    k = h @ p["wk"] + p["bk"][0]
    v = h @ p["wv"] + p["bv"][0]
    q = q.reshape(B, T, H, D).transpose(0, 2, 1, 3)
    k = k.reshape(B, T, H, D).transpose(0, 2, 1, 3)
    v = v.reshape(B, T, H, D).transpose(0, 2, 1, 3)
    att = jnp.einsum("bhtd,bhsd->bhts", q, k) * SCALE
    mask = jnp.tril(jnp.ones((T, T), bool))
    att = jnp.where(mask, att, -jnp.inf)
    att = jax.nn.softmax(att, axis=-1)
    y = jnp.einsum("bhts,bhsd->bhtd", att, v)
    y = y.transpose(0, 2, 1, 3).reshape(B, T, C)
    y = y @ p["wo"] + p["bo"][0]
    x1 = x + y
    h2 = ln(x1, p["ln2w"][0], p["ln2b"][0])
    f = h2 @ p["wfc"] + p["bfc"][0]
    g = jax.nn.gelu(f, approximate=False)
    m = g @ p["wpr"] + p["bpr"][0]
    return x1 + m


def init_params(key):
    ks = jax.random.split(key, 16)
    s = 0.02
    p = {
        # LayerNorm params kept 2D (1, C) for TPU lane layout.
        "ln1w": 1.0 + s * jax.random.normal(ks[0], (1, C), jnp.float32),
        "ln1b": s * jax.random.normal(ks[1], (1, C), jnp.float32),
        "ln2w": 1.0 + s * jax.random.normal(ks[2], (1, C), jnp.float32),
        "ln2b": s * jax.random.normal(ks[3], (1, C), jnp.float32),
        # Linear weights stored (in, out) == W.T of torch's (out, in)
        "wq": s * jax.random.normal(ks[4], (C, C), jnp.float32),
        "wk": s * jax.random.normal(ks[5], (C, C), jnp.float32),
        "wv": s * jax.random.normal(ks[6], (C, C), jnp.float32),
        "wo": s * jax.random.normal(ks[7], (C, C), jnp.float32),
        "wfc": s * jax.random.normal(ks[8], (C, 4 * C), jnp.float32),
        "wpr": s * jax.random.normal(ks[9], (4 * C, C), jnp.float32),
        "bq": s * jax.random.normal(ks[10], (1, C), jnp.float32),
        "bk": s * jax.random.normal(ks[11], (1, C), jnp.float32),
        "bv": s * jax.random.normal(ks[12], (1, C), jnp.float32),
        "bo": s * jax.random.normal(ks[13], (1, C), jnp.float32),
        "bfc": s * jax.random.normal(ks[14], (1, 4 * C), jnp.float32),
        "bpr": s * jax.random.normal(ks[15], (1, C), jnp.float32),
    }
    return p


if __name__ == "__main__":
    key = jax.random.PRNGKey(0)
    kx, kp = jax.random.split(key)
    x = jax.random.normal(kx, (B, T, C), jnp.float32)
    params = init_params(kp)

    out = jax.block_until_ready(transformer_block(x, params))
    ref = ref_block(x, params)

    assert out.shape == (B, T, C)
    # Tolerance slightly relaxed vs exact math because the softmax uses the
    # EUP approximate reciprocal (pl.reciprocal(..., approx=True)).
    assert jnp.allclose(out, ref, atol=5e-4, rtol=5e-4), (
        float(jnp.max(jnp.abs(out - ref))))

    print("KERNEL_OK")
</pallas_src>

<mosaic_0001>
module attributes {stable_mosaic.version = 11 : i64} {
  func.func @block_kernel(%arg0: i32, %arg1: memref<2x8x32xf32, #tpu.memory_space<vmem>>, %arg2: memref<16x16xf32, #tpu.memory_space<vmem>>, %arg3: memref<1x32xf32, #tpu.memory_space<vmem>>, %arg4: memref<1x32xf32, #tpu.memory_space<vmem>>, %arg5: memref<32x96xf32, #tpu.memory_space<vmem>>, %arg6: memref<1x96xf32, #tpu.memory_space<vmem>>, %arg7: memref<32x32xf32, #tpu.memory_space<vmem>>, %arg8: memref<1x32xf32, #tpu.memory_space<vmem>>, %arg9: memref<1x32xf32, #tpu.memory_space<vmem>>, %arg10: memref<1x32xf32, #tpu.memory_space<vmem>>, %arg11: memref<32x128xf32, #tpu.memory_space<vmem>>, %arg12: memref<1x128xf32, #tpu.memory_space<vmem>>, %arg13: memref<128x32xf32, #tpu.memory_space<vmem>>, %arg14: memref<1x32xf32, #tpu.memory_space<vmem>>, %arg15: memref<2x8x32xf32, #tpu.memory_space<vmem>>) attributes {dimension_semantics = [#tpu.dimension_semantics<arbitrary>], iteration_bounds = array<i64: 1>, scalar_prefetch = 0 : i64, scratch_operands = 0 : i64, tpu.core_type = #tpu.core_type<tc>, window_params = [{pipeline_mode = #tpu.pipeline_mode<synchronous>, transform_indices = @transform_0, window_bounds = array<i64: 2, 8, 32>}, {pipeline_mode = #tpu.pipeline_mode<synchronous>, transform_indices = @transform_1, window_bounds = array<i64: 16, 16>}, {pipeline_mode = #tpu.pipeline_mode<synchronous>, transform_indices = @transform_2, window_bounds = array<i64: 1, 32>}, {pipeline_mode = #tpu.pipeline_mode<synchronous>, transform_indices = @transform_3, window_bounds = array<i64: 1, 32>}, {pipeline_mode = #tpu.pipeline_mode<synchronous>, transform_indices = @transform_4, window_bounds = array<i64: 32, 96>}, {pipeline_mode = #tpu.pipeline_mode<synchronous>, transform_indices = @transform_5, window_bounds = array<i64: 1, 96>}, {pipeline_mode = #tpu.pipeline_mode<synchronous>, transform_indices = @transform_6, window_bounds = array<i64: 32, 32>}, {pipeline_mode = #tpu.pipeline_mode<synchronous>, transform_indices = @transform_7, window_bounds = array<i64: 1, 32>}, {pipeline_mode = #tpu.pipeline_mode<synchronous>, transform_indices = @transform_8, window_bounds = array<i64: 1, 32>}, {pipeline_mode = #tpu.pipeline_mode<synchronous>, transform_indices = @transform_9, window_bounds = array<i64: 1, 32>}, {pipeline_mode = #tpu.pipeline_mode<synchronous>, transform_indices = @transform_10, window_bounds = array<i64: 32, 128>}, {pipeline_mode = #tpu.pipeline_mode<synchronous>, transform_indices = @transform_11, window_bounds = array<i64: 1, 128>}, {pipeline_mode = #tpu.pipeline_mode<synchronous>, transform_indices = @transform_12, window_bounds = array<i64: 128, 32>}, {pipeline_mode = #tpu.pipeline_mode<synchronous>, transform_indices = @transform_13, window_bounds = array<i64: 1, 32>}, {pipeline_mode = #tpu.pipeline_mode<synchronous>, transform_indices = @transform_14, window_bounds = array<i64: 2, 8, 32>}]} {
    %c0 = arith.constant 0 : index
    %c0_0 = arith.constant 0 : index
    %c0_1 = arith.constant 0 : index
    %0 = vector.load %arg1[%c0, %c0_0, %c0_1] : memref<2x8x32xf32, #tpu.memory_space<vmem>>, vector<2x8x32xf32>
    %1 = vector.shape_cast %0 : vector<2x8x32xf32> to vector<16x32xf32>
    %c0_2 = arith.constant 0 : index
    %c0_3 = arith.constant 0 : index
    %2 = vector.load %arg2[%c0_2, %c0_3] : memref<16x16xf32, #tpu.memory_space<vmem>>, vector<16x16xf32>
    %c0_4 = arith.constant 0 : index
    %c0_5 = arith.constant 0 : index
    %3 = vector.load %arg3[%c0_4, %c0_5] : memref<1x32xf32, #tpu.memory_space<vmem>>, vector<1x32xf32>
    %c0_6 = arith.constant 0 : index
    %c0_7 = arith.constant 0 : index
    %4 = vector.load %arg4[%c0_6, %c0_7] : memref<1x32xf32, #tpu.memory_space<vmem>>, vector<1x32xf32>
    %cst = arith.constant dense<0.000000e+00> : vector<16xf32>
    %5 = vector.multi_reduction <add>, %1, %cst [1] : vector<16x32xf32> to vector<16xf32>
    %6 = vector.shape_cast %5 : vector<16xf32> to vector<16x1xf32>
    %cst_8 = arith.constant 3.200000e+01 : f32
    %7 = vector.broadcast %cst_8 : f32 to vector<16x1xf32>
    %8 = arith.divf %6, %7 : vector<16x1xf32>
    %9 = vector.broadcast %8 : vector<16x1xf32> to vector<16x32xf32>
    %10 = arith.subf %1, %9 : vector<16x32xf32>
    %11 = arith.mulf %10, %10 : vector<16x32xf32>
    %cst_9 = arith.constant dense<0.000000e+00> : vector<16xf32>
    %12 = vector.multi_reduction <add>, %11, %cst_9 [1] : vector<16x32xf32> to vector<16xf32>
    %13 = vector.shape_cast %12 : vector<16xf32> to vector<16x1xf32>
    %cst_10 = arith.constant 3.200000e+01 : f32
    %14 = vector.broadcast %cst_10 : f32 to vector<16x1xf32>
    %15 = arith.divf %13, %14 : vector<16x1xf32>
    %16 = vector.broadcast %8 : vector<16x1xf32> to vector<16x32xf32>
    %17 = arith.subf %1, %16 : vector<16x32xf32>
    %cst_11 = arith.constant 9.99999974E-6 : f32
    %18 = vector.broadcast %cst_11 : f32 to vector<16x1xf32>
    %19 = arith.addf %15, %18 : vector<16x1xf32>
    %20 = math.rsqrt %19 : vector<16x1xf32>
    %21 = vector.broadcast %20 : vector<16x1xf32> to vector<16x32xf32>
    %22 = arith.mulf %17, %21 : vector<16x32xf32>
    %23 = vector.broadcast %3 : vector<1x32xf32> to vector<16x32xf32>
    %24 = arith.mulf %22, %23 : vector<16x32xf32>
    %25 = vector.broadcast %4 : vector<1x32xf32> to vector<16x32xf32>
    %26 = arith.addf %24, %25 : vector<16x32xf32>
    %c0_12 = arith.constant 0 : index
    %c0_13 = arith.constant 0 : index
    %27 = vector.load %arg5[%c0_12, %c0_13] : memref<32x96xf32, #tpu.memory_space<vmem>>, vector<32x96xf32>
    %cst_14 = arith.constant dense<0.000000e+00> : vector<16x96xf32>
    %28 = tpu.matmul %26, %27, %cst_14 {dimension_numbers = #tpu.dot_dimension_numbers<[1], [0], [0], [1], [0, 0, 1, 1], [], []>} : vector<16x32xf32>, vector<32x96xf32>, vector<16x96xf32> -> vector<16x96xf32>
    %c0_15 = arith.constant 0 : index
    %c0_16 = arith.constant 0 : index
    %29 = vector.load %arg6[%c0_15, %c0_16] : memref<1x96xf32, #tpu.memory_space<vmem>>, vector<1x96xf32>
    %30 = vector.broadcast %29 : vector<1x96xf32> to vector<16x96xf32>
    %31 = arith.addf %28, %30 : vector<16x96xf32>
    %32 = vector.extract_strided_slice %31 {offsets = [0, 0], sizes = [16, 32], strides = [1, 1]} : vector<16x96xf32> to vector<16x32xf32>
    %33 = vector.extract_strided_slice %31 {offsets = [0, 32], sizes = [16, 32], strides = [1, 1]} : vector<16x96xf32> to vector<16x32xf32>
    %34 = vector.extract_strided_slice %31 {offsets = [0, 64], sizes = [16, 32], strides = [1, 1]} : vector<16x96xf32> to vector<16x32xf32>
    %35 = vector.extract_strided_slice %32 {offsets = [0, 0], sizes = [16, 8], strides = [1, 1]} : vector<16x32xf32> to vector<16x8xf32>
    %36 = vector.extract_strided_slice %33 {offsets = [0, 0], sizes = [16, 8], strides = [1, 1]} : vector<16x32xf32> to vector<16x8xf32>
    %37 = vector.extract_strided_slice %34 {offsets = [0, 0], sizes = [16, 8], strides = [1, 1]} : vector<16x32xf32> to vector<16x8xf32>
    %cst_17 = arith.constant dense<0.000000e+00> : vector<16x16xf32>
    %38 = tpu.matmul %35, %36, %cst_17 {dimension_numbers = #tpu.dot_dimension_numbers<[1], [1], [0], [0], [0, 0, 1, 0], [], []>} : vector<16x8xf32>, vector<16x8xf32>, vector<16x16xf32> -> vector<16x16xf32>
    %cst_18 = arith.constant 0.353553385 : f32
    %39 = vector.broadcast %cst_18 : f32 to vector<16x16xf32>
    %40 = arith.mulf %38, %39 : vector<16x16xf32>
    %41 = arith.addf %40, %2 : vector<16x16xf32>
    %cst_19 = arith.constant dense<0xFF800000> : vector<16xf32>
    %42 = vector.multi_reduction <maximumf>, %41, %cst_19 [1] : vector<16x16xf32> to vector<16xf32>
    %43 = vector.shape_cast %42 : vector<16xf32> to vector<16x1xf32>
    %44 = vector.broadcast %43 : vector<16x1xf32> to vector<16x16xf32>
    %45 = arith.subf %41, %44 : vector<16x16xf32>
    %46 = math.exp %45 : vector<16x16xf32>
    %cst_20 = arith.constant dense<0.000000e+00> : vector<16xf32>
    %47 = vector.multi_reduction <add>, %46, %cst_20 [1] : vector<16x16xf32> to vector<16xf32>
    %48 = vector.shape_cast %47 : vector<16xf32> to vector<16x1xf32>
    %49 = tpu.reciprocal %48 {approx = true} : vector<16x1xf32> -> vector<16x1xf32>
    %50 = vector.broadcast %49 : vector<16x1xf32> to vector<16x16xf32>
    %51 = arith.mulf %46, %50 : vector<16x16xf32>
    %cst_21 = arith.constant dense<0.000000e+00> : vector<16x8xf32>
    %52 = tpu.matmul %51, %37, %cst_21 {dimension_numbers = #tpu.dot_dimension_numbers<[1], [0], [0], [1], [0, 0, 1, 1], [], []>} : vector<16x16xf32>, vector<16x8xf32>, vector<16x8xf32> -> vector<16x8xf32>
    %53 = vector.extract_strided_slice %32 {offsets = [0, 8], sizes = [16, 8], strides = [1, 1]} : vector<16x32xf32> to vector<16x8xf32>
    %54 = vector.extract_strided_slice %33 {offsets = [0, 8], sizes = [16, 8], strides = [1, 1]} : vector<16x32xf32> to vector<16x8xf32>
    %55 = vector.extract_strided_slice %34 {offsets = [0, 8], sizes = [16, 8], strides = [1, 1]} : vector<16x32xf32> to vector<16x8xf32>
    %cst_22 = arith.constant dense<0.000000e+00> : vector<16x16xf32>
    %56 = tpu.matmul %53, %54, %cst_22 {dimension_numbers = #tpu.dot_dimension_numbers<[1], [1], [0], [0], [0, 0, 1, 0], [], []>} : vector<16x8xf32>, vector<16x8xf32>, vector<16x16xf32> -> vector<16x16xf32>
    %cst_23 = arith.constant 0.353553385 : f32
    %57 = vector.broadcast %cst_23 : f32 to vector<16x16xf32>
    %58 = arith.mulf %56, %57 : vector<16x16xf32>
    %59 = arith.addf %58, %2 : vector<16x16xf32>
    %cst_24 = arith.constant dense<0xFF800000> : vector<16xf32>
    %60 = vector.multi_reduction <maximumf>, %59, %cst_24 [1] : vector<16x16xf32> to vector<16xf32>
    %61 = vector.shape_cast %60 : vector<16xf32> to vector<16x1xf32>
    %62 = vector.broadcast %61 : vector<16x1xf32> to vector<16x16xf32>
    %63 = arith.subf %59, %62 : vector<16x16xf32>
    %64 = math.exp %63 : vector<16x16xf32>
    %cst_25 = arith.constant dense<0.000000e+00> : vector<16xf32>
    %65 = vector.multi_reduction <add>, %64, %cst_25 [1] : vector<16x16xf32> to vector<16xf32>
    %66 = vector.shape_cast %65 : vector<16xf32> to vector<16x1xf32>
    %67 = tpu.reciprocal %66 {approx = true} : vector<16x1xf32> -> vector<16x1xf32>
    %68 = vector.broadcast %67 : vector<16x1xf32> to vector<16x16xf32>
    %69 = arith.mulf %64, %68 : vector<16x16xf32>
    %cst_26 = arith.constant dense<0.000000e+00> : vector<16x8xf32>
    %70 = tpu.matmul %69, %55, %cst_26 {dimension_numbers = #tpu.dot_dimension_numbers<[1], [0], [0], [1], [0, 0, 1, 1], [], []>} : vector<16x16xf32>, vector<16x8xf32>, vector<16x8xf32> -> vector<16x8xf32>
    %71 = vector.extract_strided_slice %32 {offsets = [0, 16], sizes = [16, 8], strides = [1, 1]} : vector<16x32xf32> to vector<16x8xf32>
    %72 = vector.extract_strided_slice %33 {offsets = [0, 16], sizes = [16, 8], strides = [1, 1]} : vector<16x32xf32> to vector<16x8xf32>
    %73 = vector.extract_strided_slice %34 {offsets = [0, 16], sizes = [16, 8], strides = [1, 1]} : vector<16x32xf32> to vector<16x8xf32>
    %cst_27 = arith.constant dense<0.000000e+00> : vector<16x16xf32>
    %74 = tpu.matmul %71, %72, %cst_27 {dimension_numbers = #tpu.dot_dimension_numbers<[1], [1], [0], [0], [0, 0, 1, 0], [], []>} : vector<16x8xf32>, vector<16x8xf32>, vector<16x16xf32> -> vector<16x16xf32>
    %cst_28 = arith.constant 0.353553385 : f32
    %75 = vector.broadcast %cst_28 : f32 to vector<16x16xf32>
    %76 = arith.mulf %74, %75 : vector<16x16xf32>
    %77 = arith.addf %76, %2 : vector<16x16xf32>
    %cst_29 = arith.constant dense<0xFF800000> : vector<16xf32>
    %78 = vector.multi_reduction <maximumf>, %77, %cst_29 [1] : vector<16x16xf32> to vector<16xf32>
    %79 = vector.shape_cast %78 : vector<16xf32> to vector<16x1xf32>
    %80 = vector.broadcast %79 : vector<16x1xf32> to vector<16x16xf32>
    %81 = arith.subf %77, %80 : vector<16x16xf32>
    %82 = math.exp %81 : vector<16x16xf32>
    %cst_30 = arith.constant dense<0.000000e+00> : vector<16xf32>
    %83 = vector.multi_reduction <add>, %82, %cst_30 [1] : vector<16x16xf32> to vector<16xf32>
    %84 = vector.shape_cast %83 : vector<16xf32> to vector<16x1xf32>
    %85 = tpu.reciprocal %84 {approx = true} : vector<16x1xf32> -> vector<16x1xf32>
    %86 = vector.broadcast %85 : vector<16x1xf32> to vector<16x16xf32>
    %87 = arith.mulf %82, %86 : vector<16x16xf32>
    %cst_31 = arith.constant dense<0.000000e+00> : vector<16x8xf32>
    %88 = tpu.matmul %87, %73, %cst_31 {dimension_numbers = #tpu.dot_dimension_numbers<[1], [0], [0], [1], [0, 0, 1, 1], [], []>} : vector<16x16xf32>, vector<16x8xf32>, vector<16x8xf32> -> vector<16x8xf32>
    %89 = vector.extract_strided_slice %32 {offsets = [0, 24], sizes = [16, 8], strides = [1, 1]} : vector<16x32xf32> to vector<16x8xf32>
    %90 = vector.extract_strided_slice %33 {offsets = [0, 24], sizes = [16, 8], strides = [1, 1]} : vector<16x32xf32> to vector<16x8xf32>
    %91 = vector.extract_strided_slice %34 {offsets = [0, 24], sizes = [16, 8], strides = [1, 1]} : vector<16x32xf32> to vector<16x8xf32>
    %cst_32 = arith.constant dense<0.000000e+00> : vector<16x16xf32>
    %92 = tpu.matmul %89, %90, %cst_32 {dimension_numbers = #tpu.dot_dimension_numbers<[1], [1], [0], [0], [0, 0, 1, 0], [], []>} : vector<16x8xf32>, vector<16x8xf32>, vector<16x16xf32> -> vector<16x16xf32>
    %cst_33 = arith.constant 0.353553385 : f32
    %93 = vector.broadcast %cst_33 : f32 to vector<16x16xf32>
    %94 = arith.mulf %92, %93 : vector<16x16xf32>
    %95 = arith.addf %94, %2 : vector<16x16xf32>
    %cst_34 = arith.constant dense<0xFF800000> : vector<16xf32>
    %96 = vector.multi_reduction <maximumf>, %95, %cst_34 [1] : vector<16x16xf32> to vector<16xf32>
    %97 = vector.shape_cast %96 : vector<16xf32> to vector<16x1xf32>
    %98 = vector.broadcast %97 : vector<16x1xf32> to vector<16x16xf32>
    %99 = arith.subf %95, %98 : vector<16x16xf32>
    %100 = math.exp %99 : vector<16x16xf32>
    %cst_35 = arith.constant dense<0.000000e+00> : vector<16xf32>
    %101 = vector.multi_reduction <add>, %100, %cst_35 [1] : vector<16x16xf32> to vector<16xf32>
    %102 = vector.shape_cast %101 : vector<16xf32> to vector<16x1xf32>
    %103 = tpu.reciprocal %102 {approx = true} : vector<16x1xf32> -> vector<16x1xf32>
    %104 = vector.broadcast %103 : vector<16x1xf32> to vector<16x16xf32>
    %105 = arith.mulf %100, %104 : vector<16x16xf32>
    %cst_36 = arith.constant dense<0.000000e+00> : vector<16x8xf32>
    %106 = tpu.matmul %105, %91, %cst_36 {dimension_numbers = #tpu.dot_dimension_numbers<[1], [0], [0], [1], [0, 0, 1, 1], [], []>} : vector<16x16xf32>, vector<16x8xf32>, vector<16x8xf32> -> vector<16x8xf32>
    %107 = tpu.concatenate %52, %70, %88, %106 in 1 : vector<16x8xf32>, vector<16x8xf32>, vector<16x8xf32>, vector<16x8xf32> -> vector<16x32xf32>
    %c0_37 = arith.constant 0 : index
    %c0_38 = arith.constant 0 : index
    %108 = vector.load %arg7[%c0_37, %c0_38] : memref<32x32xf32, #tpu.memory_space<vmem>>, vector<32x32xf32>
    %cst_39 = arith.constant dense<0.000000e+00> : vector<16x32xf32>
    %109 = tpu.matmul %107, %108, %cst_39 {dimension_numbers = #tpu.dot_dimension_numbers<[1], [0], [0], [1], [0, 0, 1, 1], [], []>} : vector<16x32xf32>, vector<32x32xf32>, vector<16x32xf32> -> vector<16x32xf32>
    %c0_40 = arith.constant 0 : index
    %c0_41 = arith.constant 0 : index
    %110 = vector.load %arg8[%c0_40, %c0_41] : memref<1x32xf32, #tpu.memory_space<vmem>>, vector<1x32xf32>
    %111 = vector.broadcast %110 : vector<1x32xf32> to vector<16x32xf32>
    %112 = arith.addf %109, %111 : vector<16x32xf32>
    %113 = arith.addf %1, %112 : vector<16x32xf32>
    %c0_42 = arith.constant 0 : index
    %c0_43 = arith.constant 0 : index
    %114 = vector.load %arg9[%c0_42, %c0_43] : memref<1x32xf32, #tpu.memory_space<vmem>>, vector<1x32xf32>
    %c0_44 = arith.constant 0 : index
    %c0_45 = arith.constant 0 : index
    %115 = vector.load %arg10[%c0_44, %c0_45] : memref<1x32xf32, #tpu.memory_space<vmem>>, vector<1x32xf32>
    %cst_46 = arith.constant dense<0.000000e+00> : vector<16xf32>
    %116 = vector.multi_reduction <add>, %113, %cst_46 [1] : vector<16x32xf32> to vector<16xf32>
    %117 = vector.shape_cast %116 : vector<16xf32> to vector<16x1xf32>
    %cst_47 = arith.constant 3.200000e+01 : f32
    %118 = vector.broadcast %cst_47 : f32 to vector<16x1xf32>
    %119 = arith.divf %117, %118 : vector<16x1xf32>
    %120 = vector.broadcast %119 : vector<16x1xf32> to vector<16x32xf32>
    %121 = arith.subf %113, %120 : vector<16x32xf32>
    %122 = arith.mulf %121, %121 : vector<16x32xf32>
    %cst_48 = arith.constant dense<0.000000e+00> : vector<16xf32>
    %123 = vector.multi_reduction <add>, %122, %cst_48 [1] : vector<16x32xf32> to vector<16xf32>
    %124 = vector.shape_cast %123 : vector<16xf32> to vector<16x1xf32>
    %cst_49 = arith.constant 3.200000e+01 : f32
    %125 = vector.broadcast %cst_49 : f32 to vector<16x1xf32>
    %126 = arith.divf %124, %125 : vector<16x1xf32>
    %127 = vector.broadcast %119 : vector<16x1xf32> to vector<16x32xf32>
    %128 = arith.subf %113, %127 : vector<16x32xf32>
    %cst_50 = arith.constant 9.99999974E-6 : f32
    %129 = vector.broadcast %cst_50 : f32 to vector<16x1xf32>
    %130 = arith.addf %126, %129 : vector<16x1xf32>
    %131 = math.rsqrt %130 : vector<16x1xf32>
    %132 = vector.broadcast %131 : vector<16x1xf32> to vector<16x32xf32>
    %133 = arith.mulf %128, %132 : vector<16x32xf32>
    %134 = vector.broadcast %114 : vector<1x32xf32> to vector<16x32xf32>
    %135 = arith.mulf %133, %134 : vector<16x32xf32>
    %136 = vector.broadcast %115 : vector<1x32xf32> to vector<16x32xf32>
    %137 = arith.addf %135, %136 : vector<16x32xf32>
    %c0_51 = arith.constant 0 : index
    %c0_52 = arith.constant 0 : index
    %138 = vector.load %arg11[%c0_51, %c0_52] : memref<32x128xf32, #tpu.memory_space<vmem>>, vector<32x128xf32>
    %cst_53 = arith.constant dense<0.000000e+00> : vector<16x128xf32>
    %139 = tpu.matmul %137, %138, %cst_53 {dimension_numbers = #tpu.dot_dimension_numbers<[1], [0], [0], [1], [0, 0, 1, 1], [], []>} : vector<16x32xf32>, vector<32x128xf32>, vector<16x128xf32> -> vector<16x128xf32>
    %c0_54 = arith.constant 0 : index
    %c0_55 = arith.constant 0 : index
    %140 = vector.load %arg12[%c0_54, %c0_55] : memref<1x128xf32, #tpu.memory_space<vmem>>, vector<1x128xf32>
    %141 = vector.broadcast %140 : vector<1x128xf32> to vector<16x128xf32>
    %142 = arith.addf %139, %141 : vector<16x128xf32>
    %cst_56 = arith.constant 5.000000e-01 : f32
    %143 = vector.broadcast %cst_56 : f32 to vector<16x128xf32>
    %144 = arith.mulf %143, %142 : vector<16x128xf32>
    %cst_57 = arith.constant 0.707106769 : f32
    %145 = vector.broadcast %cst_57 : f32 to vector<16x128xf32>
    %146 = arith.mulf %142, %145 : vector<16x128xf32>
    %147 = math.erf %146 : vector<16x128xf32>
    %cst_58 = arith.constant 1.000000e+00 : f32
    %148 = vector.broadcast %cst_58 : f32 to vector<16x128xf32>
    %149 = arith.addf %148, %147 : vector<16x128xf32>
    %150 = arith.mulf %144, %149 : vector<16x128xf32>
    %c0_59 = arith.constant 0 : index
    %c0_60 = arith.constant 0 : index
    %151 = vector.load %arg13[%c0_59, %c0_60] : memref<128x32xf32, #tpu.memory_space<vmem>>, vector<128x32xf32>
    %cst_61 = arith.constant dense<0.000000e+00> : vector<16x32xf32>
    %152 = tpu.matmul %150, %151, %cst_61 {dimension_numbers = #tpu.dot_dimension_numbers<[1], [0], [0], [1], [0, 0, 1, 1], [], []>} : vector<16x128xf32>, vector<128x32xf32>, vector<16x32xf32> -> vector<16x32xf32>
    %c0_62 = arith.constant 0 : index
    %c0_63 = arith.constant 0 : index
    %153 = vector.load %arg14[%c0_62, %c0_63] : memref<1x32xf32, #tpu.memory_space<vmem>>, vector<1x32xf32>
    %154 = vector.broadcast %153 : vector<1x32xf32> to vector<16x32xf32>
    %155 = arith.addf %152, %154 : vector<16x32xf32>
    %156 = arith.addf %113, %155 : vector<16x32xf32>
    %157 = vector.shape_cast %156 : vector<16x32xf32> to vector<2x8x32xf32>
    %c0_64 = arith.constant 0 : index
    %c0_65 = arith.constant 0 : index
    %c0_66 = arith.constant 0 : index
    %158 = vector.load %arg15[%c0_64, %c0_65, %c0_66] : memref<2x8x32xf32, #tpu.memory_space<vmem>>, vector<2x8x32xf32>
    tpu.vector_store %arg15[%c0_64, %c0_65, %c0_66], %157 {strides = array<i32>} : memref<2x8x32xf32, #tpu.memory_space<vmem>>, vector<2x8x32xf32>,
    return
  }
  func.func @transform_0(%arg0: i32) -> (i32, i32, i32) {
    %c0_i32 = arith.constant 0 : i32
    %c0_i32_0 = arith.constant 0 : i32
    %c0_i32_1 = arith.constant 0 : i32
    %c0_i32_2 = arith.constant 0 : i32
    return %c0_i32, %c0_i32_0, %c0_i32_1 : i32, i32, i32
  }
  func.func @transform_1(%arg0: i32) -> (i32, i32) {
    %c0_i32 = arith.constant 0 : i32
    %c0_i32_0 = arith.constant 0 : i32
    %c0_i32_1 = arith.constant 0 : i32
    return %c0_i32, %c0_i32_0 : i32, i32
  }
  func.func @transform_2(%arg0: i32) -> (i32, i32) {
    %c0_i32 = arith.constant 0 : i32
    %c0_i32_0 = arith.constant 0 : i32
    %c0_i32_1 = arith.constant 0 : i32
    return %c0_i32, %c0_i32_0 : i32, i32
  }
  func.func @transform_3(%arg0: i32) -> (i32, i32) {
    %c0_i32 = arith.constant 0 : i32
    %c0_i32_0 = arith.constant 0 : i32
    %c0_i32_1 = arith.constant 0 : i32
    return %c0_i32, %c0_i32_0 : i32, i32
  }
  func.func @transform_4(%arg0: i32) -> (i32, i32) {
    %c0_i32 = arith.constant 0 : i32
    %c0_i32_0 = arith.constant 0 : i32
    %c0_i32_1 = arith.constant 0 : i32
    return %c0_i32, %c0_i32_0 : i32, i32
  }
  func.func @transform_5(%arg0: i32) -> (i32, i32) {
    %c0_i32 = arith.constant 0 : i32
    %c0_i32_0 = arith.constant 0 : i32
    %c0_i32_1 = arith.constant 0 : i32
    return %c0_i32, %c0_i32_0 : i32, i32
  }
  func.func @transform_6(%arg0: i32) -> (i32, i32) {
    %c0_i32 = arith.constant 0 : i32
    %c0_i32_0 = arith.constant 0 : i32
    %c0_i32_1 = arith.constant 0 : i32
    return %c0_i32, %c0_i32_0 : i32, i32
  }
  func.func @transform_7(%arg0: i32) -> (i32, i32) {
    %c0_i32 = arith.constant 0 : i32
    %c0_i32_0 = arith.constant 0 : i32
    %c0_i32_1 = arith.constant 0 : i32
    return %c0_i32, %c0_i32_0 : i32, i32
  }
  func.func @transform_8(%arg0: i32) -> (i32, i32) {
    %c0_i32 = arith.constant 0 : i32
    %c0_i32_0 = arith.constant 0 : i32
    %c0_i32_1 = arith.constant 0 : i32
    return %c0_i32, %c0_i32_0 : i32, i32
  }
  func.func @transform_9(%arg0: i32) -> (i32, i32) {
    %c0_i32 = arith.constant 0 : i32
    %c0_i32_0 = arith.constant 0 : i32
    %c0_i32_1 = arith.constant 0 : i32
    return %c0_i32, %c0_i32_0 : i32, i32
  }
  func.func @transform_10(%arg0: i32) -> (i32, i32) {
    %c0_i32 = arith.constant 0 : i32
    %c0_i32_0 = arith.constant 0 : i32
    %c0_i32_1 = arith.constant 0 : i32
    return %c0_i32, %c0_i32_0 : i32, i32
  }
  func.func @transform_11(%arg0: i32) -> (i32, i32) {
    %c0_i32 = arith.constant 0 : i32
    %c0_i32_0 = arith.constant 0 : i32
    %c0_i32_1 = arith.constant 0 : i32
    return %c0_i32, %c0_i32_0 : i32, i32
  }
  func.func @transform_12(%arg0: i32) -> (i32, i32) {
    %c0_i32 = arith.constant 0 : i32
    %c0_i32_0 = arith.constant 0 : i32
    %c0_i32_1 = arith.constant 0 : i32
    return %c0_i32, %c0_i32_0 : i32, i32
  }
  func.func @transform_13(%arg0: i32) -> (i32, i32) {
    %c0_i32 = arith.constant 0 : i32
    %c0_i32_0 = arith.constant 0 : i32
    %c0_i32_1 = arith.constant 0 : i32
    return %c0_i32, %c0_i32_0 : i32, i32
  }
  func.func @transform_14(%arg0: i32) -> (i32, i32, i32) {
    %c0_i32 = arith.constant 0 : i32
    %c0_i32_0 = arith.constant 0 : i32
    %c0_i32_1 = arith.constant 0 : i32
    %c0_i32_2 = arith.constant 0 : i32
    return %c0_i32, %c0_i32_0, %c0_i32_1 : i32, i32, i32
  }
}

</mosaic_0001>

<bundles_post_ra>
// kernel: tpu_custom_call.1
= control target key start
LH: loop header
LB: loop body
LE: loop exit
PB: predicated region body
PF: predicated region fallthrough
CT: control target
= control target key end

     0   :  { %vm54_vm0 = vcmask 261120   ;;  %s2210_s0 = inlined_call_operand.vmem [shape: f32[2,8,32], index: 0, kind: input, shape index: {}]   ;;  %s2211_s1 = inlined_call_operand.vmem [shape: f32[16,16], index: 1, kind: input, shape index: {}]   ;;  %s2212_s2 = inlined_call_operand.vmem [shape: f32[1,32], index: 2, kind: input, shape index: {}]   ;;  %s2213_s3 = inlined_call_operand.vmem [shape: f32[1,32], index: 3, kind: input, shape index: {}]   ;;  %s2214_s4 = inlined_call_operand.vmem [shape: f32[32,96], index: 4, kind: input, shape index: {}]   ;;  %s2215_s5 = inlined_call_operand.vmem [shape: f32[1,96], index: 5, kind: input, shape index: {}]   ;;  %s2216_s6 = inlined_call_operand.vmem [shape: f32[32,32], index: 6, kind: input, shape index: {}]   ;;  %s2217_s7 = inlined_call_operand.vmem [shape: f32[1,32], index: 7, kind: input, shape index: {}]   ;;  %s2218_s8 = inlined_call_operand.vmem [shape: f32[1,32], index: 8, kind: input, shape index: {}]   ;;  %s2219_s9 = inlined_call_operand.vmem [shape: f32[1,32], index: 9, kind: input, shape index: {}]   ;;  %s2220_s10 = inlined_call_operand.vmem [shape: f32[32,128], index: 10, kind: input, shape index: {}]   ;;  %s2221_s11 = inlined_call_operand.vmem [shape: f32[1,128], index: 11, kind: input, shape index: {}]   ;;  %s2222_s12 = inlined_call_operand.vmem [shape: f32[128,32], index: 12, kind: input, shape index: {}]   ;;  %s2223_s13 = inlined_call_operand.vmem [shape: f32[1,32], index: 13, kind: input, shape index: {}]   ;;  %s2224_s14 = inlined_call_operand.hbm [shape: f32[2,8,32], index: 14, kind: output, shape index: {}]  }
   0x1   :  { %v1939_v0 = vld [vmem:[%s2210_s0] sm:$0xff]  ;;  %v1944_v1 = vld [vmem:[%s2210_s0 + $0x8] sm:$0xff] }
   0x2   :  { %19 = vsyncpa [#allocation3], 0  ;;  %v55_v2 = vsel %vm54_vm0, %v1939_v0, 0.0  ;;  %v58_v3 = vsel %vm54_vm0, %v1944_v1, 0.0  ;;  %v98_v14 = vld [vmem:[%s2214_s4] sm:$0xff]  ;;  %v99_v15 = vld [vmem:[%s2214_s4 + $0x8] sm:$0xff] }
   0x3   :  { %56 = vadd.xlane.f32.xlu0 %v55_v2  ;;  %v100_v16 = vld [vmem:[%s2214_s4 + $0x10] sm:$0xff]  ;;  %v1625_v17 = vpack.c.bf16 %v99_v15, %v98_v14  ;;  %v101_v18 = vld [vmem:[%s2214_s4 + $0x18] sm:$0xff]  ;;  %v1395_v27 = vld [vmem:[%s2212_s2] ss:$0 sm:$0xff]  ;;  %vm196_vm1 = vcmask 64512   ;;  %s1845_s2 = smov 88  }
   0x4   :  { %v1629_v19 = vpack.c.bf16 %v101_v18, %v100_v16  ;;  %v1396_v29 = vld [vmem:[%s2213_s3] ss:$0 sm:$0xff]  ;;  %s1846_s3 = smov 96   ;;  %s1847_s29 = smov 80   ;;  %vm1990_vm2 = vmpackc.low %vm196_vm1, %vm196_vm1  ;;  %vm284_vm3 = vcmask 130048   ;;  %vm1034_vm4 = vcmask 195584  }
   0x5   :  { %1626 = vmatprep.subr.bf16.mxu1 %v1625_v17  ;;  %v1397_v36 = vld [vmem:[%s2215_s5] ss:$0 sm:$0xff]  ;;  %s1848_s5 = smov 120   ;;  %s1849_s30 = smov 112  }
   0x6   :  { %1628 = vmatpush3.bf16.msra.mxu1 %v1625_v17  ;;  %s1850_s18 = smov 48   ;;  %s1851_s19 = smov 104  }
   0x7   :  { %59 = vadd.xlane.f32.xlu0 %v58_v3  ;;  %1630 = vmatprep.subr.bf16.mxu1 %v1629_v19  ;;  %s1853_s20 = smov 64   ;;  %s1854_s21 = smov 40  }
   0x8   :  { %s1855_s22 = smov 56   ;;  %s1856_s23 = smov 16  }
   0xa   :  { %1632 = vmatpush3.bf16.msra.mxu1 %v1629_v19 }
  0x90   :  { %v57_v4 = vpop.xlane.xlu0 %56 }
  0x91   :  { %v62_v5 = vmul.f32 0.03125, %v57_v4 }
  0x93   :  { %v64_v6 = vsub.f32 %v1939_v0, %v62_v5  ;;  %v2015_v5 = vld [vmem:[%s2211_s1 + $0x8] sm:$0xff] }
  0x94   :  { %v60_v7 = vpop.xlane.xlu0 %59 }
  0x95   :  { %v63_v8 = vmul.f32 0.03125, %v60_v7  ;;  %v66_v9 = vmul.f32 %v64_v6, %v64_v6  ;;  %v2021_v7 = vld [vmem:[%s2211_s1] sm:$0xff]  ;;  %s1852_s1 = smov 72  }
  0x97   :  { %v65_v10 = vsub.f32 %v1944_v1, %v63_v8  ;;  %v68_v11 = vsel %vm54_vm0, %v66_v9, 0.0 }
  0x98   :  { %69 = vadd.xlane.f32.xlu1 %v68_v11 }
  0x99   :  { %v67_v12 = vmul.f32 %v65_v10, %v65_v10 }
  0x9b   :  { %v71_v13 = vsel %vm54_vm0, %v67_v12, 0.0 }
  0x9c   :  { %72 = vadd.xlane.f32.xlu1 %v71_v13 }
 0x125   :  { %v70_v20 = vpop.xlane.xlu1 %69 }
 0x126   :  { %v74_v21 = vmul.f32 0.03125, %v70_v20 }
 0x128   :  { %v76_v22 = vadd.f32 1e-05, %v74_v21 }
 0x129   :  { %v73_v23 = vpop.xlane.xlu1 %72 }
 0x12a   :  { %1777 = vrsqrt.f32 %v76_v22  ;;  %v75_v24 = vmul.f32 0.03125, %v73_v23 }
 0x12c   :  { %v77_v25 = vadd.f32 1e-05, %v75_v24 }
 0x12e   :  { %1779 = vrsqrt.f32 %v77_v25 }
 0x134   :  { %v1778_v26 = vpop.eup %1777 }
 0x135   :  { %v80_v28 = vmul.f32 %v1778_v26, %v64_v6 }
 0x137   :  { %v88_v30 = vmul.f32 %v1395_v27, %v80_v28 }
 0x138   :  { %v1780_v31 = vpop.eup %1779 }
 0x139   :  { %v81_v32 = vmul.f32 %v1780_v31, %v65_v10  ;;  %v96_v33 = vadd.f32 %v1396_v29, %v88_v30 }
 0x13b   :  { %v89_v34 = vmul.f32 %v1395_v27, %v81_v32  ;;  %1509 = vmatprep.mubr.msk.f32.mxu1 %vm54_vm0, %v96_v33 }
 0x13d   :  { %v97_v35 = vadd.f32 %v1396_v29, %v89_v34 }
 0x13f   :  { %1510 = vmatmul.mubr.msk.f32.vlgmr.msra.gmra.mrb[0].mxu1 %vm54_vm0, %v97_v35 }
 0x212   :  { %v1511_v37 = vpop.f32.mrb[0].mxu1 }
 0x213   :  { %v1977_v38 = vadd.f32 %v1511_v37, %v1397_v36  ;;  %v181_v39 = vpop.f32.mrb[1].mxu1 }
 0x214   :  { %v182_v40 = vadd.f32 %v1397_v36, %v181_v39 }
 0x216   :  { %1516 = vmatprep.mubr.msk.f32.mxu1 %vm196_vm1, %v182_v40  ;;  %v1981_v41 = vpack.i.bf16 %v1977_v38, %v182_v40 }
 0x218   :  { %1743 = vrot.lane.b32.xlu1 %v1981_v41, %s1845_s2  ;;  %1738 = vrot.lane.b32.xlu0 %v1981_v41, %s1846_s3  ;;  %s1859_s3 = smov [#allocation2]  }
 0x21c   :  { %1748 = vrot.lane.b32.xlu1 %v1981_v41, %s1847_s29  ;;  %396 = vrot.lane.b32.xlu0 %v1977_v38, %s1848_s5  ;;  %s1857_s29 = smov 8  }
 0x220   :  { %394 = vrot.lane.b32.xlu1 %v182_v40, %s1848_s5  ;;  %600 = vrot.lane.b32.xlu0 %v1977_v38, %s1849_s30  ;;  %s1858_s5 = smov 24  }
 0x224   :  { %598 = vrot.lane.b32.xlu1 %v182_v40, %s1849_s30 }
 0x28a   :  { %v1744_v42 = vpop.permute.xlu1 %1743  ;;  %v1739_v43 = vpop.permute.xlu0 %1738 }
 0x28b   :  { %v1746_v44 = vunpack.i.h.bf16 %v1744_v42  ;;  %v1745_v45 = vunpack.i.l.bf16 %v1744_v42  ;;  %v1741_v46 = vunpack.i.h.bf16 %v1739_v43  ;;  %v1740_v47 = vunpack.i.l.bf16 %v1739_v43 }
 0x28d   :  { %v1633_v49 = vpack.c.bf16 %v1741_v46, %v1740_v47  ;;  %v1643_v50 = vpack.c.bf16 %v1746_v44, %v1745_v45 }
 0x28e   :  { %v1749_v51 = vpop.permute.xlu1 %1748  ;;  %v397_v56 = vpop.permute.xlu0 %396 }
 0x28f   :  { %1635 = vmatprep.subr.msk.bf16.mxu1 %vm1990_vm2, %v1633_v49  ;;  %v1751_v52 = vunpack.i.h.bf16 %v1749_v51  ;;  %v1750_v53 = vunpack.i.l.bf16 %v1749_v51 }
 0x290   :  { %1638 = vmatpush3.bf16.xpose.msk.msra.mxu1 %vm1990_vm2, %v1633_v49 }
 0x291   :  { %1645 = vmatprep.subr.msk.bf16.mxu1 %vm1990_vm2, %v1643_v50  ;;  %v1653_v54 = vpack.c.bf16 %v1751_v52, %v1750_v53 }
 0x292   :  { %v395_v55 = vpop.permute.xlu1 %394  ;;  %v601_v58 = vpop.permute.xlu0 %600 }
 0x296   :  { %v599_v57 = vpop.permute.xlu1 %598 }
 0x297   :  { %1517 = vmatmul.mubr.msk.f32.vlgmr.msra.gmra.mrb[2].mxu1 %vm196_vm1, %v1977_v38 }
 0x298   :  { %1648 = vmatpush3.bf16.xpose.msk.msra.mxu1 %vm1990_vm2, %v1643_v50  ;;  %1530 = vmatprep.mubr.msk.f32.mxu1 %vm196_vm1, %v395_v55 }
 0x299   :  { %1655 = vmatprep.subr.msk.bf16.mxu1 %vm1990_vm2, %v1653_v54 }
 0x29f   :  { %1531 = vmatmul.mubr.msk.f32.vlgmr.msra.gmra.mrb[4].mxu1 %vm196_vm1, %v397_v56 }
 0x2a0   :  { %1658 = vmatpush3.bf16.xpose.msk.msra.mxu1 %vm1990_vm2, %v1653_v54  ;;  %1544 = vmatprep.mubr.msk.f32.mxu1 %vm196_vm1, %v599_v57 }
 0x2a7   :  { %1545 = vmatmul.mubr.msk.f32.vlgmr.msra.gmra.mrb[6].mxu1 %vm196_vm1, %v601_v58 }
 0x36a   :  { %v1518_v59 = vpop.f32.mrb[2].mxu1 }
 0x36b   :  { %v271_v60 = vpop.f32.mrb[3].mxu1  ;;  %v281_v28 = vmul.f32 0.35355338, %v1518_v59 }
 0x36c   :  { %v280_v11 = vmul.f32 0.35355338, %v271_v60 }
 0x36d   :  { %v283_v30 = vadd.f32 %v281_v28, %v2015_v5 }
 0x36e   :  { %v2029_v12 = vadd.f32 %v280_v11, %v2021_v7 }
 0x36f   :  { %v288_v32 = vsel %vm284_vm3, %v283_v30, -inf }
 0x370   :  { %v285_v13 = vsel %vm284_vm3, %v2029_v12, -inf }
 0x372   :  { %v1532_v61 = vpop.f32.mrb[4].mxu1 }
 0x373   :  { %v476_v62 = vpop.f32.mrb[5].mxu1  ;;  %v486_v31 = vmul.f32 0.35355338, %v1532_v61 }
 0x374   :  { %v485_v29 = vmul.f32 0.35355338, %v476_v62 }
 0x375   :  { %v488_v35 = vadd.f32 %v486_v31, %v2015_v5 }
 0x376   :  { %v487_v33 = vadd.f32 %v485_v29, %v2021_v7 }
 0x377   :  { %v492_v36 = vsel %vm284_vm3, %v488_v35, -inf }
 0x378   :  { %v489_v34 = vsel %vm284_vm3, %v487_v33, -inf }
 0x37a   :  { %v1546_v63 = vpop.f32.mrb[6].mxu1 }
 0x37b   :  { %v690_v2 = vmul.f32 0.35355338, %v1546_v63  ;;  %v680_v3 = vpop.f32.mrb[7].mxu1 }
 0x37c   :  { %v689_v4 = vmul.f32 0.35355338, %v680_v3 }
 0x37d   :  { %v692_v6 = vadd.f32 %v690_v2, %v2015_v5 }
 0x37e   :  { %v691_v8 = vadd.f32 %v689_v4, %v2021_v7 }
 0x37f   :  { %v696_v9 = vsel %vm284_vm3, %v692_v6, -inf }
 0x380   :  { %697 = vmax.xlane.f32.xlu0 %v696_v9  ;;  %v693_v10 = vsel %vm284_vm3, %v691_v8, -inf }
 0x381   :  { %694 = vmax.xlane.f32.xlu1 %v693_v10 }
 0x392   :  { %1753 = vrot.lane.b32.xlu1 %v1981_v41, %s1850_s18 }
 0x396   :  { %802 = vrot.lane.b32.xlu1 %v182_v40, %s1851_s19 }
 0x39a   :  { %804 = vrot.lane.b32.xlu1 %v1977_v38, %s1851_s19 }
 0x3be   :  { %286 = vmax.xlane.f32.xlu1 %v285_v13 }
 0x40d   :  { %v698_v14 = vpop.xlane.xlu0 %697 }
 0x40e   :  { %v700_v15 = vsub.f32 %v692_v6, %v698_v14  ;;  %v695_v16 = vpop.xlane.xlu1 %694 }
 0x40f   :  { %v699_v17 = vsub.f32 %v691_v8, %v695_v16 }
 0x410   :  { %v703_v18 = vmul.f32 1.442695, %v700_v15 }
 0x411   :  { %v701_v19 = vmul.f32 1.442695, %v699_v17 }
 0x412   :  { %1781 = vpow2.f32 %v703_v18  ;;  %v1754_v20 = vpop.permute.xlu1 %1753 }
 0x413   :  { %v1756_v21 = vunpack.i.h.bf16 %v1754_v20  ;;  %v1755_v22 = vunpack.i.l.bf16 %v1754_v20  ;;  %1783 = vpow2.f32 %v701_v19 }
 0x415   :  { %v1659_v23 = vpack.c.bf16 %v1756_v21, %v1755_v22 }
 0x416   :  { %v803_v49 = vpop.permute.xlu1 %802 }
 0x417   :  { %1660 = vmatprep.subr.bf16.mxu1 %v1659_v23 }
 0x418   :  { %1662 = vmatpush3.bf16.msra.mxu1 %v1659_v23 }
 0x41a   :  { %v805_v50 = vpop.permute.xlu1 %804 }
 0x41c   :  { %v1782_v24 = vpop.eup %1781 }
 0x41d   :  { %v708_v25 = vsel %vm284_vm3, %v1782_v24, 0.0  ;;  %v1784_v26 = vpop.eup %1783 }
 0x41e   :  { %709 = vadd.xlane.f32.xlu0 %v708_v25  ;;  %v705_v27 = vsel %vm284_vm3, %v1784_v26, 0.0 }
 0x422   :  { %706 = vadd.xlane.f32.xlu0 %v705_v27 }
 0x438   :  { %1758 = vrot.lane.b32.xlu0 %v1981_v41, %s1852_s1 }
 0x44b   :  { %v287_v53 = vpop.xlane.xlu1 %286 }
 0x44c   :  { %v291_v55 = vsub.f32 %v2029_v12, %v287_v53 }
 0x44e   :  { %v293_v60 = vmul.f32 1.442695, %v291_v55 }
 0x457   :  { %289 = vmax.xlane.f32.xlu0 %v288_v32 }
 0x45b   :  { %490 = vmax.xlane.f32.xlu0 %v489_v34 }
 0x45f   :  { %493 = vmax.xlane.f32.xlu0 %v492_v36 }
 0x4ab   :  { %v710_v37 = vpop.xlane.xlu0 %709 }
 0x4ac   :  { %1785 = vrcp.f32 %v710_v37 }
 0x4af   :  { %v707_v38 = vpop.xlane.xlu0 %706 }
 0x4b0   :  { %1787 = vrcp.f32 %v707_v38 }
 0x4b3   :  { %v1759_v39 = vpop.permute.xlu0 %1758 }
 0x4b4   :  { %v1761_v40 = vunpack.i.h.bf16 %v1759_v39  ;;  %v1760_v42 = vunpack.i.l.bf16 %v1759_v39 }
 0x4b6   :  { %v1663_v43 = vpack.c.bf16 %v1761_v40, %v1760_v42  ;;  %v1786_v44 = vpop.eup %1785 }
 0x4b7   :  { %v714_v47 = vmul.f32 %v1786_v44, %v1782_v24 }
 0x4b8   :  { %1665 = vmatprep.subr.msk.bf16.mxu1 %vm1990_vm2, %v1663_v43 }
 0x4ba   :  { %v1788_v45 = vpop.eup %1787 }
 0x4bb   :  { %v713_v46 = vmul.f32 %v1788_v45, %v1784_v26 }
 0x4bd   :  { %1551 = vmatprep.mubr.msk.f32.mxu1 %vm284_vm3, %v713_v46 }
 0x4be   :  { %1552 = vmatmul.mubr.msk.f32.vlgmr.msra.gmra.mrb[8].mxu1 %vm284_vm3, %v714_v47 }
 0x4bf   :  { %1668 = vmatpush3.bf16.xpose.msk.msra.mxu1 %vm1990_vm2, %v1663_v43  ;;  %1558 = vmatprep.mubr.msk.f32.mxu1 %vm196_vm1, %v803_v49 }
 0x4c6   :  { %1559 = vmatmul.mubr.msk.f32.vlgmr.msra.gmra.mrb[10].mxu1 %vm196_vm1, %v805_v50 }
 0x4e4   :  { %v290_v51 = vpop.xlane.xlu0 %289 }
 0x4e5   :  { %v292_v54 = vsub.f32 %v283_v30, %v290_v51 }
 0x4e7   :  { %v295_v57 = vmul.f32 1.442695, %v292_v54 }
 0x4e8   :  { %v491_v52 = vpop.xlane.xlu0 %490 }
 0x4e9   :  { %v495_v61 = vsub.f32 %v487_v33, %v491_v52  ;;  %1789 = vpow2.f32 %v295_v57 }
 0x4ea   :  { %1791 = vpow2.f32 %v293_v60 }
 0x4eb   :  { %v497_v63 = vmul.f32 1.442695, %v495_v61 }
 0x4ec   :  { %v494_v56 = vpop.xlane.xlu0 %493 }
 0x4ed   :  { %v496_v58 = vsub.f32 %v488_v35, %v494_v56 }
 0x4ef   :  { %v499_v62 = vmul.f32 1.442695, %v496_v58 }
 0x4f1   :  { %1793 = vpow2.f32 %v499_v62  ;;  %v1038_v62 = vld [vmem:[%s2216_s6 + $0x8] sm:$0xff] }
 0x4f2   :  { %1795 = vpow2.f32 %v497_v63 }
 0x4f3   :  { %v1790_v11 = vpop.eup %1789 }
 0x4f4   :  { %v1792_v13 = vpop.eup %1791  ;;  %v300_v14 = vsel %vm284_vm3, %v1790_v11, 0.0 }
 0x4f5   :  { %v297_v16 = vsel %vm284_vm3, %v1792_v13, 0.0 }
 0x4fb   :  { %v2060_v15 = vpop.eup %1793 }
 0x4fc   :  { %v1796_v17 = vpop.eup %1795 }
 0x591   :  { %v2051_v59 = vpop.f32.mrb[8].mxu1 }
 0x592   :  { %v2053_v48 = vpop.f32.mrb[9].mxu1 }
 0x599   :  { %v1560_v2 = vpop.f32.mrb[10].mxu1 }
 0x59a   :  { %v894_v3 = vmul.f32 0.35355338, %v1560_v2  ;;  %v884_v4 = vpop.f32.mrb[11].mxu1  ;;  %v1039_v2 = vld [vmem:[%s2216_s6 + $0x10] sm:$0xff] }
 0x59b   :  { %v893_v6 = vmul.f32 0.35355338, %v884_v4 }
 0x59c   :  { %v896_v8 = vadd.f32 %v894_v3, %v2015_v5  ;;  %v504_v5 = vsel %vm284_vm3, %v2060_v15, 0.0  ;;  %v1040_v3 = vld [vmem:[%s2216_s6 + $0x18] sm:$0xff] }
 0x59d   :  { %v895_v9 = vadd.f32 %v893_v6, %v2021_v7  ;;  %v501_v7 = vsel %vm284_vm3, %v1796_v17, 0.0  ;;  %v1677_v4 = vpack.c.bf16 %v1040_v3, %v1039_v2 }
 0x59e   :  { %v900_v10 = vsel %vm284_vm3, %v896_v8, -inf }
 0x59f   :  { %901 = vmax.xlane.f32.xlu0 %v900_v10  ;;  %v897_v12 = vsel %vm284_vm3, %v895_v9, -inf }
 0x5a0   :  { %898 = vmax.xlane.f32.xlu1 %v897_v12 }
 0x5a3   :  { %301 = vadd.xlane.f32.xlu0 %v300_v14 }
 0x5a4   :  { %298 = vadd.xlane.f32.xlu1 %v297_v16 }
 0x5a7   :  { %505 = vadd.xlane.f32.xlu0 %v504_v5 }
 0x5a8   :  { %502 = vadd.xlane.f32.xlu1 %v501_v7 }
 0x5b9   :  { %1763 = vrot.lane.b32.xlu1 %v1981_v41, %s1853_s20 }
 0x62c   :  { %v902_v18 = vpop.xlane.xlu0 %901 }
 0x62d   :  { %v904_v19 = vsub.f32 %v896_v8, %v902_v18  ;;  %v899_v20 = vpop.xlane.xlu1 %898 }
 0x62e   :  { %v903_v21 = vsub.f32 %v895_v9, %v899_v20  ;;  %v1424_v20 = vld [vmem:[%s2217_s7] ss:$0 sm:$0xff] }
 0x62f   :  { %v907_v22 = vmul.f32 1.442695, %v904_v19 }
 0x630   :  { %v905_v23 = vmul.f32 1.442695, %v903_v21  ;;  %v302_v24 = vpop.xlane.xlu0 %301 }
 0x631   :  { %1797 = vpow2.f32 %v907_v22  ;;  %v299_v25 = vpop.xlane.xlu1 %298 }
 0x632   :  { %1799 = vpow2.f32 %v905_v23 }
 0x633   :  { %1801 = vrcp.f32 %v302_v24 }
 0x634   :  { %1803 = vrcp.f32 %v299_v25  ;;  %v506_v42 = vpop.xlane.xlu0 %505 }
 0x635   :  { %v503_v26 = vpop.xlane.xlu1 %502 }
 0x636   :  { %1805 = vrcp.f32 %v503_v26 }
 0x637   :  { %1807 = vrcp.f32 %v506_v42  ;;  %v1178_v42 = vld [vmem:[%s2220_s10 + $0x18] sm:$0xff] }
 0x639   :  { %v1764_v27 = vpop.permute.xlu1 %1763 }
 0x63a   :  { %v1766_v28 = vunpack.i.h.bf16 %v1764_v27  ;;  %v1765_v29 = vunpack.i.l.bf16 %v1764_v27 }
 0x63b   :  { %v1798_v30 = vpop.eup %1797 }
 0x63c   :  { %v1800_v31 = vpop.eup %1799  ;;  %v912_v32 = vsel %vm284_vm3, %v1798_v30, 0.0  ;;  %v1639_v33 = vpack.c.bf16 %v1766_v28, %v1765_v29 }
 0x63d   :  { %v1802_v34 = vpop.eup %1801  ;;  %913 = vadd.xlane.f32.xlu0 %v912_v32  ;;  %v909_v35 = vsel %vm284_vm3, %v1800_v31, 0.0 }
 0x63e   :  { %v1804_v36 = vpop.eup %1803  ;;  %910 = vadd.xlane.f32.xlu1 %v909_v35  ;;  %1640 = vmatprep.subr.bf16.mxu0 %v1639_v33  ;;  %v306_v39 = vmul.f32 %v1802_v34, %v1790_v11 }
 0x63f   :  { %1642 = vmatpush3.bf16.msra.mxu0 %v1639_v33  ;;  %v305_v37 = vmul.f32 %v1804_v36, %v1792_v13 }
 0x640   :  { %v1806_v38 = vpop.eup %1805 }
 0x641   :  { %1523 = vmatprep.mubr.msk.f32.mxu0 %vm284_vm3, %v305_v37  ;;  %v509_v40 = vmul.f32 %v1806_v38, %v1796_v17  ;;  %v1808_v53 = vpop.eup %1807  ;;  %v1175_v37 = vld [vmem:[%s2220_s10] sm:$0xff]  ;;  %v1176_v38 = vld [vmem:[%s2220_s10 + $0x8] sm:$0xff] }
 0x642   :  { %1524 = vmatmul.mubr.msk.f32.vlgmr.msra.gmra.mrb[0].mxu0 %vm284_vm3, %v306_v39  ;;  %v510_v55 = vmul.f32 %v1808_v53, %v2060_v15  ;;  %v1681_v39 = vpack.c.bf16 %v1176_v38, %v1175_v37 }
 0x643   :  { %1537 = vmatprep.mubr.msk.f32.mxu0 %vm284_vm3, %v509_v40  ;;  %v1177_v40 = vld [vmem:[%s2220_s10 + $0x10] sm:$0xff] }
 0x644   :  { %1682 = vmatprep.subr.bf16.mxu1 %v1681_v39 }
 0x645   :  { %1684 = vmatpush3.bf16.msra.mxu1 %v1681_v39 }
 0x64f   :  { %1773 = vrot.lane.b32.xlu1 %v1981_v41, %s1854_s21 }
 0x653   :  { %1768 = vrot.lane.b32.xlu0 %v1981_v41, %s1855_s22 }
 0x657   :  { %1016 = vrot.lane.b32.xlu0 %v2053_v48, %s1856_s23  ;;  %v1037_v48 = vld [vmem:[%s2216_s6] sm:$0xff] }
 0x658   :  { %v1673_v63 = vpack.c.bf16 %v1038_v62, %v1037_v48  ;;  %v1428_v62 = vld [vmem:[%s2219_s9] ss:$0 sm:$0xff] }
 0x6ca   :  { %v914_v43 = vpop.xlane.xlu0 %913 }
 0x6cb   :  { %1809 = vrcp.f32 %v914_v43  ;;  %v911_v44 = vpop.xlane.xlu1 %910  ;;  %v1685_v43 = vpack.c.bf16 %v1178_v42, %v1177_v40 }
 0x6cc   :  { %1811 = vrcp.f32 %v911_v44  ;;  %v1277_v44 = vld [vmem:[%s2222_s12] sm:$0xff] }
 0x6cd   :  { %1686 = vmatprep.subr.bf16.mxu1 %v1685_v43 }
 0x6ce   :  { %v1769_v45 = vpop.permute.xlu0 %1768  ;;  %1688 = vmatpush3.bf16.msra.mxu1 %v1685_v43 }
 0x6cf   :  { %v1771_v46 = vunpack.i.h.bf16 %v1769_v45  ;;  %v1770_v47 = vunpack.i.l.bf16 %v1769_v45  ;;  %v1774_v49 = vpop.permute.xlu1 %1773  ;;  %v1278_v45 = vld [vmem:[%s2222_s12 + $0x8] sm:$0xff] }
 0x6d0   :  { %v1776_v50 = vunpack.i.h.bf16 %v1774_v49  ;;  %v1775_v51 = vunpack.i.l.bf16 %v1774_v49  ;;  %v1280_v49 = vld [vmem:[%s2222_s12 + $0x18] sm:$0xff] }
 0x6d1   :  { %v1649_v52 = vpack.c.bf16 %v1771_v46, %v1770_v47  ;;  %v1279_v46 = vld [vmem:[%s2222_s12 + $0x10] sm:$0xff]  ;;  %v1689_v47 = vpack.c.bf16 %v1278_v45, %v1277_v44 }
 0x6d2   :  { %v1669_v54 = vpack.c.bf16 %v1776_v50, %v1775_v51  ;;  %v1017_v11 = vpop.permute.xlu0 %1016  ;;  %v1693_v50 = vpack.c.bf16 %v1280_v49, %v1279_v46  ;;  %v1281_v51 = vld [vmem:[%s2222_s12 + $0x20] sm:$0xff] }
 0x6d3   :  { %1650 = vmatprep.subr.bf16.mxu0 %v1649_v52 }
 0x6d4   :  { %1652 = vmatpush3.bf16.msra.mxu0 %v1649_v52  ;;  %v1282_v52 = vld [vmem:[%s2222_s12 + $0x28] sm:$0xff] }
 0x6d5   :  { %v1810_v41 = vpop.eup %1809  ;;  %1670 = vmatprep.subr.bf16.mxu0 %v1669_v54  ;;  %v1697_v53 = vpack.c.bf16 %v1282_v52, %v1281_v51 }
 0x6d6   :  { %v1812_v56 = vpop.eup %1811  ;;  %v918_v58 = vmul.f32 %v1810_v41, %v1798_v30 }
 0x6d7   :  { %1538 = vmatmul.mubr.msk.f32.vlgmr.msra.gmra.mrb[2].mxu0 %vm284_vm3, %v510_v55  ;;  %v917_v57 = vmul.f32 %v1812_v56, %v1800_v31 }
 0x6d8   :  { %1672 = vmatpush3.bf16.msra.mxu0 %v1669_v54 }
 0x6d9   :  { %1565 = vmatprep.mubr.msk.f32.mxu0 %vm284_vm3, %v917_v57  ;;  %1674 = vmatprep.subr.bf16.mxu0 %v1673_v63 }
 0x6db   :  { %1566 = vmatmul.mubr.msk.f32.vlgmr.msra.gmra.mrb[4].mxu0 %vm284_vm3, %v918_v58 }
 0x6dc   :  { %1676 = vmatpush3.bf16.msra.mxu0 %v1673_v63 }
 0x6dd   :  { %1678 = vmatprep.subr.bf16.mxu0 %v1677_v4 }
 0x6e0   :  { %1680 = vmatpush3.bf16.msra.mxu0 %v1677_v4 }
 0x6e1   :  { %1690 = vmatprep.subr.bf16.mxu0 %v1689_v47 }
 0x715   :  { %v1525_v60 = vpop.f32.mrb[0].mxu0 }
 0x716   :  { %v385_v61 = vpop.f32.mrb[1].mxu0 }
 0x7aa   :  { %v1539_v6 = vpop.f32.mrb[2].mxu0 }
 0x7ab   :  { %v589_v8 = vpop.f32.mrb[3].mxu0 }
 0x7ac   :  { %1008 = vrot.lane.b32.xlu1 %v589_v8, %s1857_s29 }
 0x7ae   :  { %v1567_v9 = vpop.f32.mrb[4].mxu0 }
 0x7af   :  { %v997_v10 = vpop.f32.mrb[5].mxu0 }
 0x7b0   :  { %1010 = vrot.lane.b32.xlu1 %v1539_v6, %s1857_s29  ;;  %1024 = vrot.lane.b32.xlu0 %v997_v10, %s1858_s5  ;;  %v1284_v10 = vld [vmem:[%s2222_s12 + $0x38] sm:$0xff] }
 0x7b4   :  { %1018 = vrot.lane.b32.xlu1 %v2051_v59, %s1856_s23 }
 0x7b8   :  { %1026 = vrot.lane.b32.xlu1 %v1567_v9, %s1858_s5  ;;  %v1283_v9 = vld [vmem:[%s2222_s12 + $0x30] sm:$0xff]  ;;  %s1384_s5 = sshll.u32 %s1859_s3, 4  ;;  %s1385_s5 = int_to_ptr.vmem [resolvable:$true] %s1384_s5 }
 0x7b9   :  { %s1821_s6 = scalar_lea.vmem %s1385_s5, 256  ;;  %p1826_p1 = scmp.lt.s32.totalorder %s1385_s5, %s1385_s5 }
 0x7ba   :  { %p1822_p0 = scmp.ne.s32.totalorder %s1385_s5, %s1821_s6  ;;  %p1827_p2 = scmp.lt.s32.totalorder %s1821_s6, %s1821_s6 }
 0x7bc   :  { %p1828_p3 = por %p1827_p2, %p1826_p1 }
 0x7be   :  { %p1829_p4 = pnand %p1828_p3, %p1822_p0 }
 0x81e   :  { %v1009_v12 = vpop.permute.xlu1 %1008 }
 0x81f   :  { %v1030_v13 = vsel %vm196_vm1, %v385_v61, %v1009_v12  ;;  %v1427_v61 = vld [vmem:[%s2218_s8] ss:$0 sm:$0xff] }
 0x820   :  { %v1032_v15 = vsel %vm284_vm3, %v1030_v13, %v1017_v11  ;;  %v1701_v11 = vpack.c.bf16 %v1284_v10, %v1283_v9  ;;  %v1285_v12 = vld [vmem:[%s2222_s12 + $0x40] sm:$0xff]  ;;  %v1286_v13 = vld [vmem:[%s2222_s12 + $0x48] sm:$0xff] }
 0x822   :  { %v1011_v14 = vpop.permute.xlu1 %1010  ;;  %v1025_v16 = vpop.permute.xlu0 %1024 }
 0x823   :  { %v1035_v17 = vsel %vm1034_vm4, %v1032_v15, %v1025_v16  ;;  %v1031_v7 = vsel %vm196_vm1, %v1525_v60, %v1011_v14  ;;  %v1705_v14 = vpack.c.bf16 %v1286_v13, %v1285_v12  ;;  %v1287_v15 = vld [vmem:[%s2222_s12 + $0x50] sm:$0xff]  ;;  %v1288_v16 = vld [vmem:[%s2222_s12 + $0x58] sm:$0xff] }
 0x824   :  { %1576 = vmatprep.mubr.msk.f32.mxu0 %vm54_vm0, %v1035_v17  ;;  %v1709_v17 = vpack.c.bf16 %v1288_v16, %v1287_v15 }
 0x826   :  { %v1019_v5 = vpop.permute.xlu1 %1018 }
 0x827   :  { %v1033_v18 = vsel %vm284_vm3, %v1031_v7, %v1019_v5  ;;  %v1289_v5 = vld [vmem:[%s2222_s12 + $0x60] sm:$0xff]  ;;  %v1290_v7 = vld [vmem:[%s2222_s12 + $0x68] sm:$0xff] }
 0x82a   :  { %v1027_v19 = vpop.permute.xlu1 %1026 }
 0x82b   :  { %v1036_v59 = vsel %vm1034_vm4, %v1033_v18, %v1027_v19  ;;  %v1713_v18 = vpack.c.bf16 %v1290_v7, %v1289_v5  ;;  %v1291_v19 = vld [vmem:[%s2222_s12 + $0x70] sm:$0xff] }
 0x82c   :  { %1577 = vmatmul.mubr.msk.f32.vlgmr.msra.gmra.mrb[6].mxu0 %vm54_vm0, %v1036_v59  ;;  %v1292_v59 = vld [vmem:[%s2222_s12 + $0x78] sm:$0xff] }
 0x82d   :  { %1692 = vmatpush3.bf16.msra.mxu0 %v1689_v47 }
 0x82e   :  { %1694 = vmatprep.subr.bf16.mxu0 %v1693_v50 }
 0x831   :  { %1696 = vmatpush3.bf16.msra.mxu0 %v1693_v50 }
 0x832   :  { %1698 = vmatprep.subr.bf16.mxu0 %v1697_v53 }
 0x835   :  { %1700 = vmatpush3.bf16.msra.mxu0 %v1697_v53 }
 0x836   :  { %1702 = vmatprep.subr.bf16.mxu0 %v1701_v11 }
 0x839   :  { %1704 = vmatpush3.bf16.msra.mxu0 %v1701_v11 }
 0x83a   :  { %1706 = vmatprep.subr.bf16.mxu0 %v1705_v14 }
 0x83d   :  { %1708 = vmatpush3.bf16.msra.mxu0 %v1705_v14 }
 0x83e   :  { %1710 = vmatprep.subr.bf16.mxu0 %v1709_v17 }
 0x841   :  { %1712 = vmatpush3.bf16.msra.mxu0 %v1709_v17 }
 0x842   :  { %1714 = vmatprep.subr.bf16.mxu0 %v1713_v18 }
 0x845   :  { %1716 = vmatpush3.bf16.msra.mxu0 %v1713_v18 }
 0x8ff   :  { %v1578_v21 = vpop.f32.mrb[6].mxu0 }
 0x900   :  { %v1126_v22 = vadd.f32 %v1578_v21, %v1424_v20  ;;  %v1120_v23 = vpop.f32.mrb[7].mxu0  ;;  %v1429_v21 = vld [vmem:[%s2221_s11] ss:$0 sm:$0xff] }
 0x901   :  { %v1121_v24 = vadd.f32 %v1424_v20, %v1120_v23  ;;  %v1717_v20 = vpack.c.bf16 %v1292_v59, %v1291_v19 }
 0x902   :  { %v2106_v25 = vadd.f32 %v1126_v22, %v1944_v1 }
 0x903   :  { %v2109_v26 = vadd.f32 %v1121_v24, %v1939_v0  ;;  %1718 = vmatprep.subr.bf16.mxu0 %v1717_v20 }
 0x904   :  { %v1136_v27 = vsel %vm54_vm0, %v2106_v25, 0.0  ;;  %1720 = vmatpush3.bf16.msra.mxu0 %v1717_v20 }
 0x905   :  { %1137 = vadd.xlane.f32.xlu1 %v1136_v27  ;;  %v1133_v28 = vsel %vm54_vm0, %v2109_v26, 0.0 }
 0x906   :  { %1134 = vadd.xlane.f32.xlu0 %v1133_v28 }
 0x992   :  { %v1138_v29 = vpop.xlane.xlu1 %1137 }
 0x993   :  { %v1140_v30 = vmul.f32 0.03125, %v1138_v29  ;;  %v1135_v31 = vpop.xlane.xlu0 %1134 }
 0x994   :  { %v1139_v32 = vmul.f32 0.03125, %v1135_v31 }
 0x995   :  { %v1142_v33 = vsub.f32 %v2106_v25, %v1140_v30 }
 0x996   :  { %v1141_v1 = vsub.f32 %v2109_v26, %v1139_v32 }
 0x997   :  { %v1144_v35 = vmul.f32 %v1142_v33, %v1142_v33 }
 0x998   :  { %v1143_v34 = vmul.f32 %v1141_v1, %v1141_v1 }
 0x999   :  { %v1148_v36 = vsel %vm54_vm0, %v1144_v35, 0.0 }
 0x99a   :  { %v1145_v0 = vsel %vm54_vm0, %v1143_v34, 0.0 }
 0x99b   :  { %1146 = vadd.xlane.f32.xlu0 %v1145_v0 }
 0x99f   :  { %1149 = vadd.xlane.f32.xlu0 %v1148_v36  ;;  %v1432_v36 = vld [vmem:[%s2223_s13] ss:$0 sm:$0xff] }
 0xa28   :  { %v1147_v54 = vpop.xlane.xlu0 %1146 }
 0xa29   :  { %v1151_v41 = vmul.f32 0.03125, %v1147_v54 }
 0xa2b   :  { %v1153_v55 = vadd.f32 1e-05, %v1151_v41 }
 0xa2c   :  { %v1150_v56 = vpop.xlane.xlu0 %1149 }
 0xa2d   :  { %1813 = vrsqrt.f32 %v1153_v55  ;;  %v1152_v57 = vmul.f32 0.03125, %v1150_v56 }
 0xa2f   :  { %v1154_v58 = vadd.f32 1e-05, %v1152_v57 }
 0xa31   :  { %1815 = vrsqrt.f32 %v1154_v58 }
 0xa37   :  { %v1814_v60 = vpop.eup %1813 }
 0xa38   :  { %v1157_v48 = vmul.f32 %v1814_v60, %v1141_v1 }
 0xa3a   :  { %v1165_v63 = vmul.f32 %v1427_v61, %v1157_v48 }
 0xa3b   :  { %v1816_v2 = vpop.eup %1815 }
 0xa3c   :  { %v1158_v3 = vmul.f32 %v1816_v2, %v1142_v33  ;;  %v1173_v4 = vadd.f32 %v1428_v62, %v1165_v63 }
 0xa3e   :  { %v1166_v6 = vmul.f32 %v1427_v61, %v1158_v3  ;;  %1587 = vmatprep.mubr.msk.f32.mxu1 %vm54_vm0, %v1173_v4 }
 0xa40   :  { %v1174_v8 = vadd.f32 %v1428_v62, %v1166_v6 }
 0xa42   :  { %1588 = vmatmul.mubr.msk.f32.vlgmr.msra.gmra.mrb[12].mxu1 %vm54_vm0, %v1174_v8 }
 0xb15   :  { %v1589_v22 = vpop.f32.mrb[12].mxu1 }
 0xb16   :  { %v1264_v23 = vadd.f32 %v1589_v22, %v1429_v21  ;;  %v1258_v24 = vpop.f32.mrb[13].mxu1 }
 0xb17   :  { %v1259_v27 = vadd.f32 %v1429_v21, %v1258_v24 }
 0xb18   :  { %v1270_v28 = vmul.f32 0.70710677, %v1264_v23  ;;  %v1268_v34 = vmul.f32 0.5, %v1264_v23 }
 0xb19   :  { %v1269_v29 = vmul.f32 0.70710677, %v1259_v27  ;;  %v1267_v33 = vmul.f32 0.5, %v1259_v27 }
 0xb1a   :  { %1817 = verf.f32 %v1270_v28 }
 0xb1b   :  { %1819 = verf.f32 %v1269_v29 }
 0xb24   :  { %v1818_v30 = vpop.eup %1817 }
 0xb25   :  { %v1820_v31 = vpop.eup %1819  ;;  %v1274_v32 = vadd.f32 1.0, %v1818_v30 }
 0xb26   :  { %v1273_v1 = vadd.f32 1.0, %v1820_v31 }
 0xb27   :  { %v1276_v35 = vmul.f32 %v1274_v32, %v1268_v34 }
 0xb28   :  { %v1275_v0 = vmul.f32 %v1273_v1, %v1267_v33 }
 0xb2a   :  { %1622 = vmatprep.mubr.f32.mxu0 %v1275_v0 }
 0xb2b   :  { %1623 = vmatmul.mubr.f32.vlgmr.msra.gmra.mrb[8].mxu0 %v1276_v35 }
 0xbfe   :  { %v1624_v37 = vpop.f32.mrb[8].mxu0 }
 0xbff   :  { %v1372_v38 = vadd.f32 %v1624_v37, %v1432_v36  ;;  %v1366_v39 = vpop.f32.mrb[9].mxu0 }
 0xc00   :  { %v1367_v40 = vadd.f32 %v1432_v36, %v1366_v39 }
 0xc01   :  { %v1376_v42 = vadd.f32 %v1372_v38, %v2106_v25 }
 0xc02   :  { %v1375_v43 = vadd.f32 %v1367_v40, %v2109_v26 }
 0xc03   :  { %1378 = vst.msk [vmem:[#allocation2 + $0x8] sm:$0xff] %vm54_vm0, %v1376_v42 }
 0xc04   :  { %1377 = vst.msk [vmem:[#allocation2] sm:$0xff] %vm54_vm0, %v1375_v43 }
 0xc05   :  { %1832 = shalt.err (!%p1829_p4)
}
 0xc06   :  { %s1833_s7 = scalar_lea.hbm %s2224_s14, 256 }
 0xc07   :  { %p1834_p5 = scmp.ne.s32.totalorder %s2224_s14, %s1833_s7  ;;  %p1837_p6 = scmp.lt.u32.totalorder %s1833_s7, %s2224_s14 }
 0xc09   :  { %p1839_p7 = pnand %p1837_p6, %p1834_p5 }
 0xc0b   :  { %1842 = shalt.err (!%p1839_p7)
}
 0xc0c   :  { %s1860_s0 = smov 128  }
 0xc0d   :  { %1390 = dma.vmem_to_hbm [thread:$0]  %s1385_s5, 256, %s2224_s14, [#allocation3], %s1860_s0, %s1860_s0, %s1857_s29  }
 0xc0e   :  { %1843 = dma.done.wait [#allocation3], 256  }
 0xc0f   :  { %1844 = vsyncadd [#allocation3], 4294967040 }
 0xc10   :  { %1394 = vsyncpa [#allocation3], 1 }

</bundles_post_ra>
